<compile_context>
chip_gen: v7x
topology: tpu7x:2x2x1
jax: 0.10.0
libtpu: 0.0.40
codegen_flags: <defaults>
</compile_context>

<pallas_src>
import functools

import numpy as np
import jax
import jax.numpy as jnp
from jax.experimental import pallas as pl
from jax.experimental.pallas import tpu as pltpu

# ----- static hyperparameters (mirrors Cloth.__init__ arguments) -----
HEIGHT = 16
WIDTH = 32
SPACING = 1.0
MASS = 1.0
GRAVITY = 9.8
STIFFNESS = 4.0
ALPHA = 0.003
DECAY = 0.99997
INIT_ENERGY = 1000.0
PP = 0.8                      # method == 'verlet'
# TODO(synk): torch uses wall-clock time.time() deltas for del_t; fixed here to the
# deterministic first-step value (1/150) * 13.
DT = 13.0 / 150.0

LANES = 128
FLAT_ROWS = (2 * HEIGHT * WIDTH) // LANES      # 8 -> state is one (8, 128) vreg
assert 2 * HEIGHT * WIDTH == FLAT_ROWS * LANES
assert LANES % WIDTH == 0                      # grid rows never straddle a sublane row


def _build_constants(dt):
    """Fold every per-cell constant of one verlet step into 8 coefficient planes.

    Flat layout: f = ch*(H*W) + r*W + c, viewed as (FLAT_ROWS, LANES).
      channel 0 = gravity axis (torch pos[:, :, 0]), channel 1 = torch pos[:, :, 1].
    """
    H, W, S, L = HEIGHT, WIDTH, FLAT_ROWS, LANES
    f = np.arange(2 * H * W)
    ch = f // (H * W)
    r = (f // W) % H
    c = f % W
    lane = f % L

    # pinned points: force[0, 0::9] = 0 (all cols % 9 == 0) and force[H-1, 0:W//2:9] = 0.
    pinned = ((r == 0) & (c % 9 == 0)) | ((r == H - 1) & (c % 9 == 0) & (c < W // 2))
    keep = (~pinned).astype(np.float64)

    scale = dt * dt / MASS                      # force -> position increment
    coeff = keep * STIFFNESS * scale            # spring coefficient per valid neighbour

    has_r = (c < W - 1)                         # right neighbour (c+1) exists
    has_l = (c > 0)                             # left  neighbour (c-1) exists
    has_d = (r < H - 1)                         # down  neighbour (r+1) exists (same channel)
    has_u = (r > 0)                             # up    neighbour (r-1) exists (same channel)
    deg = has_r.astype(np.float64) + has_l + has_d + has_u

    planes = np.stack([
        coeff * has_r,                          # 0: pairs with roll(p, L-1, axis=1)  -> flat f+1
        coeff * has_l,                          # 1: pairs with roll(p, 1,   axis=1)  -> flat f-1
        coeff * has_d * (lane < L - W),         # 2: roll(p, L-W, axis=1)             -> f+W, same sublane
        coeff * has_d * (lane >= L - W),        # 3: roll(roll(p, L-W, 1), S-1, 0)    -> f+W, next sublane
        coeff * has_u * (lane >= W),            # 4: roll(p, W, axis=1)               -> f-W, same sublane
        coeff * has_u * (lane < W),             # 5: roll(roll(p, W, 1), 1, 0)        -> f-W, prev sublane
        2.0 - coeff * deg,                      # 6: coefficient of p (verlet 2p minus spring pull)
        keep * (-GRAVITY * MASS) * scale * (ch == 0),   # 7: additive gravity term (channel 0 only)
    ])
    return jnp.asarray(planes.reshape(8, S, L), jnp.float32)


def _cloth_kernel(pos_ref, prev_ref, energy_l_ref, const_ref,
                  newpos_ref, newprev_ref, new_el_ref, energy_ref,
                  *, num_steps):
    S, L, W = FLAT_ROWS, LANES, WIDTH

    # coefficient planes stay resident in vregs across the whole fused rollout
    c_r = const_ref[0]
    c_l = const_ref[1]
    c_d0 = const_ref[2]
    c_d1 = const_ref[3]
    c_u0 = const_ref[4]
    c_u1 = const_ref[5]
    c_p = const_ref[6]
    c_g = const_ref[7]

    # state lives in the VMEM-resident output refs for the whole rollout; one HBM
    # read at entry, one HBM writeback at exit, regardless of num_steps.
    newpos_ref[...] = pos_ref[...]
    newprev_ref[...] = prev_ref[...]
    new_el_ref[...] = energy_l_ref[...]
    energy_ref[...] = jnp.zeros_like(energy_ref)

    @pl.loop(0, num_steps)
    def _(step):
        p = newpos_ref[...]                     # (S, L) current positions
        q = newprev_ref[...]                    # (S, L) previous positions
        e_l = new_el_ref[...]                   # (1, 1) running energy_l

        # masked 5-point stencil via XLU rotations of the flat (S, L) layout.
        # wrap-around entries of each rotation land only on masked (coefficient 0) cells.
        nb_r = pltpu.roll(p, shift=L - 1, axis=1)      # flat f+1  == column + 1
        nb_l = pltpu.roll(p, shift=1, axis=1)          # flat f-1  == column - 1
        dn = pltpu.roll(p, shift=L - W, axis=1)        # flat f+W (stays in sublane)
        dn_x = pltpu.roll(dn, shift=S - 1, axis=0)     # flat f+W (crosses into next sublane)
        up = pltpu.roll(p, shift=W, axis=1)            # flat f-W (stays in sublane)
        up_x = pltpu.roll(up, shift=1, axis=0)         # flat f-W (crosses into prev sublane)

        # verlet update with all constants pre-folded:
        #   newpos = 2p - q + keep*dt^2/m * (k*(sum_nb - deg*p) + gravity)
        newpos = (c_p * p - q + c_g
                  + c_r * nb_r + c_l * nb_l
                  + c_d0 * dn + c_d1 * dn_x
                  + c_u0 * up + c_u1 * up_x)

        d = newpos - p
        energy = jnp.sum(d * d, keepdims=True)         # (1, 1): sum over points of ||d||^2
        e_n = jnp.minimum(energy, e_l) * DECAY
        e_n = e_n * PP + energy * (1.0 - PP)
        # normalize(d) * (||d|| * ratio) == d * ratio (up to the 1e-12 normalize eps), so
        # the per-point sqrt/divide collapses to a single scalar divide per step.
        ratio = e_n / (energy + 1e-6)

        newpos_ref[...] = p + d * ratio
        newprev_ref[...] = p                            # prev_pos = old pos
        new_el_ref[...] = e_l * (1.0 - ALPHA) + e_n * ALPHA
        energy_ref[...] = energy                        # last-step energy (diagnostic)
        # TODO(synk): the torch forward prints energy every step (host side-effect); not
        # replicated inside the kernel -- only the final step's energy is returned.


@functools.partial(jax.jit, static_argnames=("num_steps", "dt"))
def cloth_step(pos, prev_pos, energy_l, *, num_steps=1, dt=DT):
    """Run `num_steps` fused physics steps.

    pos / prev_pos: (2, H, W) float32 (channel 0 = gravity axis); energy_l: (1, 1) float32.
    num_steps=1 reproduces exactly one forward() of the torch module.
    """
    consts = _build_constants(dt)
    shape2d = (FLAT_ROWS, LANES)
    pos_f = jnp.reshape(pos.astype(jnp.float32), shape2d)
    prev_f = jnp.reshape(prev_pos.astype(jnp.float32), shape2d)

    vmem = pltpu.MemorySpace.VMEM
    out_shapes = (
        jax.ShapeDtypeStruct(shape2d, jnp.float32),    # new pos (flat)
        jax.ShapeDtypeStruct(shape2d, jnp.float32),    # new prev_pos (flat)
        jax.ShapeDtypeStruct((1, 1), jnp.float32),     # new energy_l
        jax.ShapeDtypeStruct((1, 1), jnp.float32),     # energy of last step (diagnostic)
    )
    kernel = functools.partial(_cloth_kernel, num_steps=num_steps)
    new_pos_f, new_prev_f, new_el, energy = pl.pallas_call(
        kernel,
        out_shape=out_shapes,
        in_specs=[pl.BlockSpec(memory_space=vmem)] * 4,
        out_specs=tuple([pl.BlockSpec(memory_space=vmem)] * 4),
    )(pos_f, prev_f, energy_l, consts)

    new_pos = jnp.reshape(new_pos_f, (2, HEIGHT, WIDTH))
    new_prev = jnp.reshape(new_prev_f, (2, HEIGHT, WIDTH))
    return new_pos, new_prev, new_el, energy


def render(pos):
    # glue: data-dependent uint8 scatter (frame rendering) kept in plain JAX.
    img_h, img_w = 804, 804
    y = pos[0]
    x = pos[1]
    x = x / WIDTH * (img_w - 20) + 10
    y = y / HEIGHT * (img_h - 700) + 690
    x = jnp.clip(x, 0, img_w - 1).astype(jnp.int32).reshape(-1)
    y = jnp.clip(y, 0, img_h - 1).astype(jnp.int32).reshape(-1)
    frame = jnp.zeros((img_h, img_w, 3), jnp.uint8)
    frame = frame.at[y, x].set(jnp.array([0, 255, 0], jnp.uint8))
    return frame[2:802, 2:802]


if __name__ == "__main__":
    key = jax.random.PRNGKey(0)
    k1, k2 = jax.random.split(key)

    # deterministic cloth grid (meshgrid init) + small perturbation
    yy = np.arange(0, HEIGHT * SPACING, SPACING, dtype=np.float32)
    xx = np.arange(0, WIDTH * SPACING, SPACING, dtype=np.float32)
    base = np.stack(np.meshgrid(yy, xx, indexing="ij"), axis=0)  # (2, H, W)
    pos = jnp.asarray(base) + 0.01 * jax.random.normal(k1, (2, HEIGHT, WIDTH), jnp.float32)
    prev_pos = jnp.asarray(base) + 0.01 * jax.random.normal(k2, (2, HEIGHT, WIDTH), jnp.float32)
    energy_l = jnp.full((1, 1), INIT_ENERGY, jnp.float32)

    # single step == exactly one forward() of the torch module
    p1, q1, el1, e1 = cloth_step(pos, prev_pos, energy_l, num_steps=1)
    # fused rollout: 200 physics steps in ONE pallas_call (state never leaves VMEM)
    pN, qN, elN, eN = cloth_step(pos, prev_pos, energy_l, num_steps=200)

    frame = render(pN)
    jax.block_until_ready((p1, q1, el1, e1, pN, qN, elN, eN, frame))
    print("KERNEL_OK")
</pallas_src>

<mosaic_0001>
module attributes {stable_mosaic.version = 11 : i64} {
  func.func @_cloth_kernel(%arg0: memref<8x128xf32, #tpu.memory_space<vmem>>, %arg1: memref<8x128xf32, #tpu.memory_space<vmem>>, %arg2: memref<1x1xf32, #tpu.memory_space<vmem>>, %arg3: memref<8x8x128xf32, #tpu.memory_space<vmem>>, %arg4: memref<8x128xf32, #tpu.memory_space<vmem>>, %arg5: memref<8x128xf32, #tpu.memory_space<vmem>>, %arg6: memref<1x1xf32, #tpu.memory_space<vmem>>, %arg7: memref<1x1xf32, #tpu.memory_space<vmem>>) attributes {dimension_semantics = [], scalar_prefetch = 0 : i64, scratch_operands = 0 : i64, tpu.core_type = #tpu.core_type<tc>} {
    %c0 = arith.constant 0 : index
    %c0_0 = arith.constant 0 : index
    %c0_1 = arith.constant 0 : index
    %0 = vector.load %arg3[%c0, %c0_0, %c0_1] : memref<8x8x128xf32, #tpu.memory_space<vmem>>, vector<1x8x128xf32>
    %1 = vector.shape_cast %0 : vector<1x8x128xf32> to vector<8x128xf32>
    %c1 = arith.constant 1 : index
    %c0_2 = arith.constant 0 : index
    %c0_3 = arith.constant 0 : index
    %2 = vector.load %arg3[%c1, %c0_2, %c0_3] : memref<8x8x128xf32, #tpu.memory_space<vmem>>, vector<1x8x128xf32>
    %3 = vector.shape_cast %2 : vector<1x8x128xf32> to vector<8x128xf32>
    %c2 = arith.constant 2 : index
    %c0_4 = arith.constant 0 : index
    %c0_5 = arith.constant 0 : index
    %4 = vector.load %arg3[%c2, %c0_4, %c0_5] : memref<8x8x128xf32, #tpu.memory_space<vmem>>, vector<1x8x128xf32>
    %5 = vector.shape_cast %4 : vector<1x8x128xf32> to vector<8x128xf32>
    %c3 = arith.constant 3 : index
    %c0_6 = arith.constant 0 : index
    %c0_7 = arith.constant 0 : index
    %6 = vector.load %arg3[%c3, %c0_6, %c0_7] : memref<8x8x128xf32, #tpu.memory_space<vmem>>, vector<1x8x128xf32>
    %7 = vector.shape_cast %6 : vector<1x8x128xf32> to vector<8x128xf32>
    %c4 = arith.constant 4 : index
    %c0_8 = arith.constant 0 : index
    %c0_9 = arith.constant 0 : index
    %8 = vector.load %arg3[%c4, %c0_8, %c0_9] : memref<8x8x128xf32, #tpu.memory_space<vmem>>, vector<1x8x128xf32>
    %9 = vector.shape_cast %8 : vector<1x8x128xf32> to vector<8x128xf32>
    %c5 = arith.constant 5 : index
    %c0_10 = arith.constant 0 : index
    %c0_11 = arith.constant 0 : index
    %10 = vector.load %arg3[%c5, %c0_10, %c0_11] : memref<8x8x128xf32, #tpu.memory_space<vmem>>, vector<1x8x128xf32>
    %11 = vector.shape_cast %10 : vector<1x8x128xf32> to vector<8x128xf32>
    %c6 = arith.constant 6 : index
    %c0_12 = arith.constant 0 : index
    %c0_13 = arith.constant 0 : index
    %12 = vector.load %arg3[%c6, %c0_12, %c0_13] : memref<8x8x128xf32, #tpu.memory_space<vmem>>, vector<1x8x128xf32>
    %13 = vector.shape_cast %12 : vector<1x8x128xf32> to vector<8x128xf32>
    %c7 = arith.constant 7 : index
    %c0_14 = arith.constant 0 : index
    %c0_15 = arith.constant 0 : index
    %14 = vector.load %arg3[%c7, %c0_14, %c0_15] : memref<8x8x128xf32, #tpu.memory_space<vmem>>, vector<1x8x128xf32>
    %15 = vector.shape_cast %14 : vector<1x8x128xf32> to vector<8x128xf32>
    %c0_16 = arith.constant 0 : index
    %c0_17 = arith.constant 0 : index
    %16 = vector.load %arg0[%c0_16, %c0_17] : memref<8x128xf32, #tpu.memory_space<vmem>>, vector<8x128xf32>
    %c0_18 = arith.constant 0 : index
    %c0_19 = arith.constant 0 : index
    %17 = vector.load %arg4[%c0_18, %c0_19] : memref<8x128xf32, #tpu.memory_space<vmem>>, vector<8x128xf32>
    tpu.vector_store %arg4[%c0_18, %c0_19], %16 {strides = array<i32>} : memref<8x128xf32, #tpu.memory_space<vmem>>, vector<8x128xf32>,
    %c0_20 = arith.constant 0 : index
    %c0_21 = arith.constant 0 : index
    %18 = vector.load %arg1[%c0_20, %c0_21] : memref<8x128xf32, #tpu.memory_space<vmem>>, vector<8x128xf32>
    %c0_22 = arith.constant 0 : index
    %c0_23 = arith.constant 0 : index
    %19 = vector.load %arg5[%c0_22, %c0_23] : memref<8x128xf32, #tpu.memory_space<vmem>>, vector<8x128xf32>
    tpu.vector_store %arg5[%c0_22, %c0_23], %18 {strides = array<i32>} : memref<8x128xf32, #tpu.memory_space<vmem>>, vector<8x128xf32>,
    %c0_24 = arith.constant 0 : index
    %c0_25 = arith.constant 0 : index
    %20 = vector.load %arg2[%c0_24, %c0_25] : memref<1x1xf32, #tpu.memory_space<vmem>>, vector<1x1xf32>
    %c0_26 = arith.constant 0 : index
    %c0_27 = arith.constant 0 : index
    %21 = vector.load %arg6[%c0_26, %c0_27] : memref<1x1xf32, #tpu.memory_space<vmem>>, vector<1x1xf32>
    tpu.vector_store %arg6[%c0_26, %c0_27], %20 {strides = array<i32>} : memref<1x1xf32, #tpu.memory_space<vmem>>, vector<1x1xf32>,
    %cst = arith.constant 0.000000e+00 : f32
    %22 = vector.broadcast %cst : f32 to vector<1x1xf32>
    %c0_28 = arith.constant 0 : index
    %c0_29 = arith.constant 0 : index
    %23 = vector.load %arg7[%c0_28, %c0_29] : memref<1x1xf32, #tpu.memory_space<vmem>>, vector<1x1xf32>
    tpu.vector_store %arg7[%c0_28, %c0_29], %22 {strides = array<i32>} : memref<1x1xf32, #tpu.memory_space<vmem>>, vector<1x1xf32>,
    %c0_i32 = arith.constant 0 : i32
    %c0_30 = arith.constant 0 : index
    %c0_31 = arith.constant 0 : index
    %24 = vector.load %arg4[%c0_30, %c0_31] : memref<8x128xf32, #tpu.memory_space<vmem>>, vector<8x128xf32>
    %c0_32 = arith.constant 0 : index
    %c0_33 = arith.constant 0 : index
    %25 = vector.load %arg5[%c0_32, %c0_33] : memref<8x128xf32, #tpu.memory_space<vmem>>, vector<8x128xf32>
    %c0_34 = arith.constant 0 : index
    %c0_35 = arith.constant 0 : index
    %26 = vector.load %arg6[%c0_34, %c0_35] : memref<1x1xf32, #tpu.memory_space<vmem>>, vector<1x1xf32>
    %c127_i32 = arith.constant 127 : i32
    %27 = tpu.dynamic_rotate %24 by %c127_i32 dim 1 : vector<8x128xf32>, i32 -> vector<8x128xf32>
    %c1_i32 = arith.constant 1 : i32
    %28 = tpu.dynamic_rotate %24 by %c1_i32 dim 1 : vector<8x128xf32>, i32 -> vector<8x128xf32>
    %c96_i32 = arith.constant 96 : i32
    %29 = tpu.dynamic_rotate %24 by %c96_i32 dim 1 : vector<8x128xf32>, i32 -> vector<8x128xf32>
    %c7_i32 = arith.constant 7 : i32
    %30 = tpu.dynamic_rotate %29 by %c7_i32 dim 0 : vector<8x128xf32>, i32 -> vector<8x128xf32>
    %c32_i32 = arith.constant 32 : i32
    %31 = tpu.dynamic_rotate %24 by %c32_i32 dim 1 : vector<8x128xf32>, i32 -> vector<8x128xf32>
    %c1_i32_36 = arith.constant 1 : i32
    %32 = tpu.dynamic_rotate %31 by %c1_i32_36 dim 0 : vector<8x128xf32>, i32 -> vector<8x128xf32>
    %33 = arith.mulf %13, %24 : vector<8x128xf32>
    %34 = arith.subf %33, %25 : vector<8x128xf32>
    %35 = arith.addf %34, %15 : vector<8x128xf32>
    %36 = arith.mulf %1, %27 : vector<8x128xf32>
    %37 = arith.addf %35, %36 : vector<8x128xf32>
    %38 = arith.mulf %3, %28 : vector<8x128xf32>
    %39 = arith.addf %37, %38 : vector<8x128xf32>
    %40 = arith.mulf %5, %29 : vector<8x128xf32>
    %41 = arith.addf %39, %40 : vector<8x128xf32>
    %42 = arith.mulf %7, %30 : vector<8x128xf32>
    %43 = arith.addf %41, %42 : vector<8x128xf32>
    %44 = arith.mulf %9, %31 : vector<8x128xf32>
    %45 = arith.addf %43, %44 : vector<8x128xf32>
    %46 = arith.mulf %11, %32 : vector<8x128xf32>
    %47 = arith.addf %45, %46 : vector<8x128xf32>
    %48 = arith.subf %47, %24 : vector<8x128xf32>
    %49 = arith.mulf %48, %48 : vector<8x128xf32>
    %50 = vector.shape_cast %49 : vector<8x128xf32> to vector<1x8x128xf32>
    %cst_37 = arith.constant dense<0.000000e+00> : vector<1xf32>
    %51 = vector.multi_reduction <add>, %50, %cst_37 [1, 2] : vector<1x8x128xf32> to vector<1xf32>
    %52 = vector.shape_cast %51 : vector<1xf32> to vector<1x1x1xf32>
    %53 = vector.extract %52[0, 0, 0] : f32 from vector<1x1x1xf32>
    %54 = vector.broadcast %53 : f32 to vector<1x1xf32>
    %55 = arith.minimumf %54, %26 : vector<1x1xf32>
    %cst_38 = arith.constant 9.999700e-01 : f32
    %56 = vector.broadcast %cst_38 : f32 to vector<1x1xf32>
    %57 = arith.mulf %55, %56 : vector<1x1xf32>
    %cst_39 = arith.constant 8.000000e-01 : f32
    %58 = vector.broadcast %cst_39 : f32 to vector<1x1xf32>
    %59 = arith.mulf %57, %58 : vector<1x1xf32>
    %cst_40 = arith.constant 2.000000e-01 : f32
    %60 = vector.broadcast %cst_40 : f32 to vector<1x1xf32>
    %61 = arith.mulf %54, %60 : vector<1x1xf32>
    %62 = arith.addf %59, %61 : vector<1x1xf32>
    %cst_41 = arith.constant 9.99999997E-7 : f32
    %63 = vector.broadcast %cst_41 : f32 to vector<1x1xf32>
    %64 = arith.addf %54, %63 : vector<1x1xf32>
    %65 = arith.divf %62, %64 : vector<1x1xf32>
    %66 = vector.broadcast %65 : vector<1x1xf32> to vector<8x128xf32>
    %67 = arith.mulf %48, %66 : vector<8x128xf32>
    %68 = arith.addf %24, %67 : vector<8x128xf32>
    %c0_42 = arith.constant 0 : index
    %c0_43 = arith.constant 0 : index
    %69 = vector.load %arg4[%c0_42, %c0_43] : memref<8x128xf32, #tpu.memory_space<vmem>>, vector<8x128xf32>
    tpu.vector_store %arg4[%c0_42, %c0_43], %68 {strides = array<i32>} : memref<8x128xf32, #tpu.memory_space<vmem>>, vector<8x128xf32>,
    %c0_44 = arith.constant 0 : index
    %c0_45 = arith.constant 0 : index
    %70 = vector.load %arg5[%c0_44, %c0_45] : memref<8x128xf32, #tpu.memory_space<vmem>>, vector<8x128xf32>
    tpu.vector_store %arg5[%c0_44, %c0_45], %24 {strides = array<i32>} : memref<8x128xf32, #tpu.memory_space<vmem>>, vector<8x128xf32>,
    %cst_46 = arith.constant 0.996999979 : f32
    %71 = vector.broadcast %cst_46 : f32 to vector<1x1xf32>
    %72 = arith.mulf %26, %71 : vector<1x1xf32>
    %cst_47 = arith.constant 3.000000e-03 : f32
    %73 = vector.broadcast %cst_47 : f32 to vector<1x1xf32>
    %74 = arith.mulf %62, %73 : vector<1x1xf32>
    %75 = arith.addf %72, %74 : vector<1x1xf32>
    %c0_48 = arith.constant 0 : index
    %c0_49 = arith.constant 0 : index
    %76 = vector.load %arg6[%c0_48, %c0_49] : memref<1x1xf32, #tpu.memory_space<vmem>>, vector<1x1xf32>
    tpu.vector_store %arg6[%c0_48, %c0_49], %75 {strides = array<i32>} : memref<1x1xf32, #tpu.memory_space<vmem>>, vector<1x1xf32>,
    %c0_50 = arith.constant 0 : index
    %c0_51 = arith.constant 0 : index
    %77 = vector.load %arg7[%c0_50, %c0_51] : memref<1x1xf32, #tpu.memory_space<vmem>>, vector<1x1xf32>
    tpu.vector_store %arg7[%c0_50, %c0_51], %54 {strides = array<i32>} : memref<1x1xf32, #tpu.memory_space<vmem>>, vector<1x1xf32>,
    return
  }
}

</mosaic_0001>

<bundles_post_ra>
// kernel: cloth_step.1
= control target key start
LH: loop header
LB: loop body
LE: loop exit
PB: predicated region body
PF: predicated region fallthrough
CT: control target
= control target key end

     0   :  { %s349_s0 = inlined_call_operand.vmem [shape: f32[8,128], index: 0, kind: input, shape index: {}]   ;;  %s350_s1 = inlined_call_operand.vmem [shape: f32[8,128], index: 1, kind: input, shape index: {}]   ;;  %s351_s2 = inlined_call_operand.<no memory space> [shape: f32[1,1], index: 2, kind: input, shape index: {}]   ;;  %s352_s3 = inlined_call_operand.vmem [shape: f32[8,8,128], index: 3, kind: input, shape index: {}]   ;;  %s353_s4 = inlined_call_operand.vmem [shape: f32[8,128], index: 4, kind: output, shape index: {0}]   ;;  %s354_s5 = inlined_call_operand.vmem [shape: f32[8,128], index: 5, kind: output, shape index: {1}]   ;;  %s355_s6 = inlined_call_operand.hbm [shape: f32[1,1], index: 6, kind: output, shape index: {2}]   ;;  %s356_s7 = inlined_call_operand.hbm [shape: f32[1,1], index: 7, kind: output, shape index: {3}]  }
   0x1   :  { %v13_v0 = vstv %s351_s2 }
   0x2   :  { %14 = vst [vmem:[#allocation2] sm:$0x1] %v13_v0 }
   0x3   :  { %15 = vsyncpa [#allocation4], 0  ;;  %v273_v1 = vld [vmem:[%s349_s0] sm:$0xff]  ;;  %s219_s28 = smov 127   ;;  %s220_s8 = smov 96  }
   0x4   :  { %51 = vrot.lane.b32.xlu0 %v273_v1, %s219_s28  ;;  %108 = vst [vmem:[%s354_s5] sm:$0xff] %v273_v1  ;;  %55 = vrot.lane.b32.xlu1 %v273_v1, %s220_s8 }
   0x5   :  { %16 = vsyncpa [#allocation6], 0  ;;  %s221_s2 = smov 1   ;;  %s222_s9 = smov 32   ;;  %v155_v2 = vld [vmem:[%s352_s3 + $0x30] sm:$0xff]  ;;  %v42_v4 = vld [vmem:[%s350_s1] sm:$0xff]  ;;  %v97_v49 = vlaneseq }
   0x6   :  { %v61_v3 = vmul.f32 %v155_v2, %v273_v1  ;;  %v25_v6 = vld [vmem:[%s352_s3] sm:$0xff]  ;;  %v156_v7 = vld [vmem:[%s352_s3 + $0x38] sm:$0xff]  ;;  %v150_v12 = vld [vmem:[%s352_s3 + $0x8] sm:$0xff]  ;;  %vm45_vm0 = vcmask 0   ;;  %v223_v35 = vmov 0.0   ;;  %v224_v36 = vmov 0  }
   0x7   :  { %v151_v13 = vld [vmem:[%s352_s3 + $0x10] sm:$0xff]  ;;  %v152_v16 = vld [vmem:[%s352_s3 + $0x18] sm:$0xff]  ;;  %v153_v21 = vld [vmem:[%s352_s3 + $0x20] sm:$0xff]  ;;  %47 = vst.msk [vmem:[#allocation5] sm:$0x1] %vm45_vm0, %v223_v35  ;;  %167 = vset.pattern.permute.xlu1 %v224_v36  ;;  %168 = vset.pattern.permute.xlu0 %v224_v36  ;;  %v98_v54 = vshrl.u32 %v97_v49, 7 }
   0x8   :  { %53 = vrot.lane.b32.xlu0 %v273_v1, %s221_s2  ;;  %58 = vrot.lane.b32.xlu1 %v273_v1, %s222_s9  ;;  %v62_v5 = vsub.f32 %v61_v3, %v42_v4  ;;  %v154_v25 = vld [vmem:[%s352_s3 + $0x28] sm:$0xff]  ;;  %s225_s25 = smov [#allocation3]   ;;  %s226_s27 = smov [#allocation5]  }
   0x9   :  { %v44_v34 = vld [vmem:[#allocation2] sm:$0x1]  ;;  %v99_v57 = vsub.s32 0, %v98_v54  ;;  %s124_s26 = sshll.u32 %s225_s25, 4  ;;  %s134_s28 = sshll.u32 %s226_s27, 4  ;;  %s125_s26 = int_to_ptr.vmem [resolvable:$true] %s124_s26  ;;  %s135_s28 = int_to_ptr.vmem [resolvable:$true] %s134_s28 }
   0xa   :  { %v63_v9 = vadd.f32 %v156_v7, %v62_v5  ;;  %46 = vst.msk [vmem:[#allocation3] sm:$0x1] %vm45_vm0, %v44_v34  ;;  %s171_s29 = scalar_lea.vmem %s125_s26, 16  ;;  %s175_s30 = scalar_lea.vmem %s125_s26, 32 }
   0xb   :  { %p172_p0 = scmp.ne.s32.totalorder %s125_s26, %s171_s29  ;;  %p176_p1 = scmp.lt.s32.totalorder %s125_s26, %s125_s26 }
   0xc   :  { %p177_p2 = scmp.lt.s32.totalorder %s175_s30, %s171_s29 }
   0xe   :  { %p178_p3 = por %p177_p2, %p176_p1 }
  0x10   :  { %p179_p4 = pnand %p178_p3, %p172_p0 }
  0x11   :  { %v50_v44 = vld [vmem:[#allocation3] sm:$0x1] }
  0x12   :  { %v109_v53 = vmul.f32 0.997, %v50_v44 }
  0x76   :  { %v52_v8 = vpop.permute.xlu0 %51  ;;  %v56_v11 = vpop.permute.xlu1 %55 }
  0x77   :  { %v64_v10 = vmul.f32 %v52_v8, %v25_v6  ;;  %v57_v14 = vrot.slane %v56_v11, 1  ;;  %v68_v19 = vmul.f32 %v151_v13, %v56_v11 }
  0x79   :  { %v65_v17 = vadd.f32 %v64_v10, %v63_v9  ;;  %v70_v23 = vmul.f32 %v152_v16, %v57_v14 }
  0x7a   :  { %v54_v15 = vpop.permute.xlu0 %53  ;;  %v59_v20 = vpop.permute.xlu1 %58 }
  0x7b   :  { %v66_v18 = vmul.f32 %v150_v12, %v54_v15  ;;  %v60_v24 = vrot.slane %v59_v20, 7  ;;  %v72_v27 = vmul.f32 %v153_v21, %v59_v20 }
  0x7d   :  { %v67_v22 = vadd.f32 %v66_v18, %v65_v17  ;;  %v74_v29 = vmul.f32 %v154_v25, %v60_v24 }
  0x7f   :  { %v69_v26 = vadd.f32 %v68_v19, %v67_v22 }
  0x81   :  { %v71_v28 = vadd.f32 %v70_v23, %v69_v26 }
  0x83   :  { %v73_v30 = vadd.f32 %v72_v27, %v71_v28 }
  0x85   :  { %v75_v31 = vadd.f32 %v74_v29, %v73_v30 }
  0x87   :  { %v312_v32 = vsub.f32 %v75_v31, %v273_v1 }
  0x89   :  { %v77_v33 = vmul.f32 %v312_v32, %v312_v32 }
  0x8b   :  { %78 = vadd.xlane.f32.xlu0 %v77_v33 }
 0x118   :  { %v79_v37 = vpop.xlane.xlu0 %78 }
 0x119   :  { %v80_v38 = vrot.slane %v79_v37, 4 }
 0x11b   :  { %v81_v39 = vadd.f32 %v80_v38, %v79_v37 }
 0x11d   :  { %v82_v40 = vrot.slane %v81_v39, 2 }
 0x11f   :  { %v83_v41 = vadd.f32 %v82_v40, %v81_v39 }
 0x121   :  { %v84_v42 = vrot.slane %v83_v41, 1 }
 0x123   :  { %v85_v43 = vadd.f32 %v84_v42, %v83_v41 }
 0x125   :  { %157 = vpush %v85_v43 }
 0x156   :  { %s158_s3 = spop %157 }
 0x157   :  { %v87_v45 = vstv %s158_s3 }
 0x158   :  { %v88_v46 = vmin.f32 %v87_v45, %v50_v44  ;;  %v93_v47 = vadd.f32 1e-06, %v87_v45  ;;  %113 = vst.msk [vmem:[#allocation5] sm:$0x1] %vm45_vm0, %v87_v45  ;;  %v91_v51 = vmul.f32 0.2, %v87_v45 }
 0x15a   :  { %v89_v48 = vmul.f32 0.99997, %v88_v46  ;;  %169 = vrcp.f32 %v93_v47 }
 0x15c   :  { %v90_v50 = vmul.f32 0.8, %v89_v48 }
 0x15e   :  { %v92_v52 = vadd.f32 %v91_v51, %v90_v50 }
 0x160   :  { %v110_v55 = vmul.f32 0.003, %v92_v52 }
 0x162   :  { %v111_v56 = vadd.f32 %v110_v55, %v109_v53 }
 0x164   :  { %v170_v58 = vpop.eup %169  ;;  %112 = vst.msk [vmem:[#allocation3] sm:$0x1] %vm45_vm0, %v111_v56 }
 0x165   :  { %v95_v59 = vmul.f32 %v170_v58, %v92_v52 }
 0x167   :  { %v100_v60 = vrot.slane %v95_v59, %v99_v57 }
 0x169   :  { %102 = vperm.xlu1 %167, %v100_v60  }
 0x16a   :  { %182 = shalt.err (!%p179_p4)
}
 0x16b   :  { %s183_s9 = scalar_lea.hbm %s355_s6, 16 }
 0x16c   :  { %p184_p5 = scmp.ne.s32.totalorder %s355_s6, %s183_s9  ;;  %p187_p6 = scmp.lt.u32.totalorder %s183_s9, %s355_s6 }
 0x16e   :  { %p189_p7 = pnand %p187_p6, %p184_p5 }
 0x170   :  { %192 = shalt.err (!%p189_p7)
}
 0x171   :  { %127 = dma.vmem_to_hbm [thread:$0]  %s125_s26, 16, %s355_s6, [#allocation4]  }
 0x172   :  { %s193_s14 = scalar_lea.vmem %s135_s28, 16  ;;  %s197_s15 = scalar_lea.vmem %s135_s28, 32 }
 0x173   :  { %p194_p8 = scmp.ne.s32.totalorder %s135_s28, %s193_s14  ;;  %p198_p9 = scmp.lt.s32.totalorder %s135_s28, %s135_s28 }
 0x174   :  { %p199_p10 = scmp.lt.s32.totalorder %s197_s15, %s193_s14 }
 0x176   :  { %p200_p11 = por %p199_p10, %p198_p9 }
 0x178   :  { %p201_p12 = pnand %p200_p11, %p194_p8 }
 0x17a   :  { %204 = shalt.err (!%p201_p12)
}
 0x17b   :  { %s205_s18 = scalar_lea.hbm %s356_s7, 16 }
 0x17c   :  { %p206_p13 = scmp.ne.s32.totalorder %s356_s7, %s205_s18  ;;  %p209_p0 = scmp.lt.u32.totalorder %s205_s18, %s356_s7 }
 0x17e   :  { %p211_p1 = pnand %p209_p0, %p206_p13 }
 0x180   :  { %214 = shalt.err (!%p211_p1)
}
 0x181   :  { %137 = dma.vmem_to_hbm [thread:$0]  %s135_s28, 16, %s356_s7, [#allocation6]  }
 0x1e8   :  { %v103_v61 = vpop.permute.xlu1 %102 }
 0x1e9   :  { %v105_v62 = vmul.f32 %v103_v61, %v312_v32 }
 0x1eb   :  { %v106_v63 = vadd.f32 %v105_v62, %v273_v1 }
 0x1ed   :  { %107 = vst [vmem:[%s353_s4] sm:$0xff] %v106_v63 }
 0x1ee   :  { %215 = dma.done.wait [#allocation4], 16  }
 0x1ef   :  { %216 = vsyncadd [#allocation4], 4294967280 }
 0x1f0   :  { %217 = dma.done.wait [#allocation6], 16  }
 0x1f1   :  { %218 = vsyncadd [#allocation6], 4294967280 }
 0x1f2   :  { %148 = vsyncpa [#allocation4], 1 }
 0x1f3   :  { %149 = vsyncpa [#allocation6], 1 }

</bundles_post_ra>
